<compile_context>
chip_gen: v5e
topology: v5e:2x2
jax: 0.10.0
libtpu: 0.0.40
codegen_flags: <defaults>
</compile_context>

<pallas_src>
import functools

import jax
import jax.numpy as jnp
from jax import lax
from jax.experimental import pallas as pl
from jax.experimental.pallas import tpu as pltpu

EPS_DICE = 1e-08
EPS_LOG = 1e-08      # matches the reference's log(p + 1e-8) clamp
PAD_LOGIT = -30.0    # sigmoid(-30) ~ 9e-14 -> padded rows/cols contribute ~0 everywhere


def _combined_loss_kernel(logits_ref, targets_ref, pos_w_ref,
                          elem_ref, inter_ref, union_ref, *,
                          w_bce, c1, c2, gamma):
    i = pl.program_id(1)

    @pl.when(i == 0)
    def _init():
        elem_ref[...] = jnp.zeros_like(elem_ref)
        inter_ref[...] = jnp.zeros_like(inter_ref)
        union_ref[...] = jnp.zeros_like(union_ref)

    x = logits_ref[...].astype(jnp.float32)       # (tile_b, L_f)
    t = targets_ref[...].astype(jnp.float32)      # (tile_b, L_f)
    pw = pos_w_ref[...]                           # (1, L_f) f32, already scaled by w_bce

    # Shared stable pieces: one exp + one log1p per element.
    e = jnp.exp(-jnp.abs(x))
    sp_pos = jnp.log1p(e) + jnp.maximum(x, 0.0)   # softplus(x)  = -log(1-p)
    sp_neg = sp_pos - x                           # softplus(-x) = -log(p)
    probs = jnp.where(x >= 0.0, 1.0, e) / (1.0 + e)   # sigmoid(x), no second exp
    one_m_p = 1.0 - probs

    # BCEWithLogits(pos_weight) pre-scaled by w_bce (pw already folded in the wrapper).
    wsp = w_bce * sp_pos
    bce_part = wsp + t * (pw * sp_neg - wsp)

    # Focal loss, matching the reference's eps-clamped logs exactly.
    logp = jnp.log(probs + EPS_LOG)
    log1mp = jnp.log(one_m_p + EPS_LOG)
    if float(gamma) == int(gamma):
        gi = int(gamma)
        pow_omp = lax.integer_pow(one_m_p, gi)     # VPU multiplies, no EUP
        pow_p = lax.integer_pow(probs, gi)
    else:
        g = float(gamma)
        pow_omp = jnp.exp(-g * sp_pos)             # (1-p)^g
        pow_p = jnp.exp(-g * sp_neg)               # p^g
    focal_part = -(t * (c1 * pow_omp) * logp + (1.0 - t) * (c2 * pow_p) * log1mp)

    elem = bce_part + focal_part                   # already w_bce / w_focal weighted

    elem_ref[...] += jnp.sum(elem, axis=0, keepdims=True)[None]
    inter_ref[...] += jnp.sum(probs * t, axis=0, keepdims=True)[None]
    union_ref[...] += jnp.sum(probs + t, axis=0, keepdims=True)[None]


def _round_up(x, m):
    return ((x + m - 1) // m) * m


def _vmem_capacity_bytes():
    try:
        info = pltpu.get_tpu_info()
        cap = getattr(info, "vmem_capacity_bytes", None)
        if cap:
            return int(cap)
    except Exception:
        pass
    return 64 * 1024 * 1024   # conservative fallback (v7x per-core VMEM)


def _choose_layout(num_labels):
    """Return (L_pad, fold_k) such that fold_k * L_pad is a multiple of 128."""
    L = num_labels
    if L % 128 == 0:
        return L, 1
    if L > 128:
        return _round_up(L, 128), 1
    # L < 128: pad to the smallest power-of-two divisor of 128 >= L, fold the rest.
    L_pad = 1
    while L_pad < L:
        L_pad *= 2
    return L_pad, 128 // L_pad


def _pick_tile_rows(rows_needed, L_f, itemsize, vmem_cap):
    """Batch-tile rows: multiple of 8, sized so one input pipeline buffer ~ VMEM/16."""
    budget = max(vmem_cap // 16, 512 * 1024)       # bytes per input per pipeline buffer
    rows = budget // max(1, L_f * itemsize)
    rows = max(8, (rows // 8) * 8)
    cap = max(8, _round_up(rows_needed, 8))
    return int(min(rows, cap))


def combined_loss(logits, targets, pos_weight, *,
                  alpha=0.99, gamma=2, dice_weight=0.3, focal_weight=0.3,
                  cast_targets_bf16=True):
    """logits, targets: (B, L) arrays; pos_weight: (L,). Returns scalar f32 loss."""
    B, L = logits.shape
    w_bce = float(1.0 - dice_weight - focal_weight)
    c1 = float(focal_weight * alpha)
    c2 = float(focal_weight * (1.0 - alpha))

    L_pad, k = _choose_layout(L)
    L_f = k * L_pad
    col_pad = L_pad - L

    t_dtype = jnp.bfloat16 if cast_targets_bf16 else targets.dtype

    vmem_cap = _vmem_capacity_bytes()
    itemsize = max(jnp.dtype(logits.dtype).itemsize, jnp.dtype(t_dtype).itemsize)
    rows_needed = -(-B // k)                       # folded rows before batch padding
    tile_b = _pick_tile_rows(rows_needed, L_f, itemsize, vmem_cap)
    n_par = 2 if rows_needed > tile_b else 1       # split across TCs when >1 tile
    B_f = _round_up(rows_needed, tile_b * n_par)
    n_inner = B_f // (tile_b * n_par)
    row_pad = B_f * k - B

    # Pad rows/cols so every tile is full and every vreg lane is occupied.
    if row_pad or col_pad:
        logits_p = jnp.pad(logits, ((0, row_pad), (0, col_pad)),
                           constant_values=PAD_LOGIT)
        targets_p = jnp.pad(targets, ((0, row_pad), (0, col_pad)),
                            constant_values=0)
    else:
        logits_p, targets_p = logits, targets
    logits_f = logits_p.reshape(B_f, L_f)                       # contiguous lane fold
    targets_f = targets_p.astype(t_dtype).reshape(B_f, L_f)
    pos_w_f = jnp.tile(jnp.pad(pos_weight.astype(jnp.float32) * w_bce,
                               (0, col_pad)), k).reshape(1, L_f)

    in_bytes = tile_b * L_f * (jnp.dtype(logits_f.dtype).itemsize
                               + jnp.dtype(targets_f.dtype).itemsize)
    vmem_limit = int(min(max(2 * in_bytes + 8 * L_f * 4 + (4 << 20), 32 << 20),
                         vmem_cap - (8 << 20)))

    kernel = functools.partial(_combined_loss_kernel,
                               w_bce=w_bce, c1=c1, c2=c2, gamma=gamma)

    out_shape = tuple(jax.ShapeDtypeStruct((n_par, 1, L_f), jnp.float32)
                      for _ in range(3))
    acc_spec = pl.BlockSpec((1, 1, L_f), lambda p, i: (p, 0, 0))

    # TODO(synk): for extreme label counts where 8*L_f*itemsize approaches the VMEM
    # budget (v7x), add a second grid axis tiling the lane dimension.
    elem_p, inter_p, union_p = pl.pallas_call(
        kernel,
        out_shape=out_shape,
        grid=(n_par, n_inner),
        in_specs=[
            pl.BlockSpec((tile_b, L_f), lambda p, i: (p * n_inner + i, 0)),  # logits
            pl.BlockSpec((tile_b, L_f), lambda p, i: (p * n_inner + i, 0)),  # targets
            pl.BlockSpec((1, L_f), lambda p, i: (0, 0)),                     # pos_weight
        ],
        out_specs=(acc_spec, acc_spec, acc_spec),
        compiler_params=pltpu.CompilerParams(
            dimension_semantics=("parallel", "arbitrary"),
            vmem_limit_bytes=vmem_limit),
    )(logits_f, targets_f, pos_w_f)

    # Tiny epilogue in plain JAX: undo the lane fold, per-label dice, final combine.
    elem_total = jnp.sum(elem_p)                                   # bce+focal weighted sum
    inter = jnp.sum(inter_p.reshape(-1, L_pad), axis=0)[:L]        # (L,)
    union = jnp.sum(union_p.reshape(-1, L_pad), axis=0)[:L]        # (L,)
    dice_score = (2.0 * inter + EPS_DICE) / (union + EPS_DICE)
    dice_loss = jnp.mean(1.0 - dice_score)
    return elem_total / float(B * L) + float(dice_weight) * dice_loss


def _reference_combined_loss(logits, targets, pos_weight, *,
                             alpha=0.99, gamma=2, dice_weight=0.3, focal_weight=0.3):
    # pure-JAX reference mirroring the PyTorch module
    x = logits.astype(jnp.float32)
    t = targets.astype(jnp.float32)
    pw = pos_weight.astype(jnp.float32)[None, :]
    sp_pos = jax.nn.softplus(x)
    sp_neg = jax.nn.softplus(-x)
    bce = jnp.mean(pw * t * sp_neg + (1.0 - t) * sp_pos)
    p = jax.nn.sigmoid(x)
    inter = jnp.sum(p * t, axis=0)
    union = jnp.sum(p, axis=0) + jnp.sum(t, axis=0)
    dice = jnp.mean(1.0 - (2.0 * inter + EPS_DICE) / (union + EPS_DICE))
    focal = jnp.mean(-alpha * (1 - p) ** gamma * t * jnp.log(p + EPS_LOG)
                     - (1 - alpha) * p ** gamma * (1 - t) * jnp.log(1 - p + EPS_LOG))
    return ((1 - dice_weight - focal_weight) * bce + dice_weight * dice
            + focal_weight * focal)


if __name__ == "__main__":
    key = jax.random.PRNGKey(0)
    k1, k2 = jax.random.split(key)

    B, L = 8, 16   # batch=8, num_labels=16 (multi-label classification logits)
    logits = jax.random.normal(k1, (B, L), dtype=jnp.float32)
    targets = (jax.random.uniform(k2, (B, L)) > 0.5).astype(jnp.float32)
    pos_weight = jnp.linspace(0.5, 2.0, L, dtype=jnp.float32)

    loss = combined_loss(logits, targets, pos_weight,
                         alpha=0.99, gamma=2, dice_weight=0.3, focal_weight=0.3)
    loss = jax.block_until_ready(loss)

    ref = _reference_combined_loss(logits, targets, pos_weight,
                                   alpha=0.99, gamma=2, dice_weight=0.3,
                                   focal_weight=0.3)
    assert jnp.allclose(loss, ref, rtol=1e-5, atol=1e-5), (float(loss), float(ref))

    print("KERNEL_OK")
</pallas_src>

<mosaic_0001>
module attributes {stable_mosaic.version = 11 : i64} {
  func.func @_combined_loss_kernel(%arg0: i32, %arg1: i32, %arg2: memref<8x128xf32, #tpu.memory_space<vmem>>, %arg3: memref<8x128xbf16, #tpu.memory_space<vmem>>, %arg4: memref<1x128xf32, #tpu.memory_space<vmem>>, %arg5: memref<1x1x128xf32, #tpu.memory_space<vmem>>, %arg6: memref<1x1x128xf32, #tpu.memory_space<vmem>>, %arg7: memref<1x1x128xf32, #tpu.memory_space<vmem>>) attributes {dimension_semantics = [#tpu.dimension_semantics<parallel>, #tpu.dimension_semantics<arbitrary>], iteration_bounds = array<i64: 1, 1>, scalar_prefetch = 0 : i64, scratch_operands = 0 : i64, tpu.core_type = #tpu.core_type<tc>, window_params = [{transform_indices = @transform_0, window_bounds = array<i64: 8, 128>}, {transform_indices = @transform_1, window_bounds = array<i64: 8, 128>}, {pipeline_mode = #tpu.pipeline_mode<synchronous>, transform_indices = @transform_2, window_bounds = array<i64: 1, 128>}, {transform_indices = @transform_3, window_bounds = array<i64: 1, 1, 128>}, {transform_indices = @transform_4, window_bounds = array<i64: 1, 1, 128>}, {transform_indices = @transform_5, window_bounds = array<i64: 1, 1, 128>}]} {
    %c0_i32 = arith.constant 0 : i32
    %0 = arith.cmpi eq, %arg1, %c0_i32 : i32
    %1 = arith.extui %0 : i1 to i32
    %c0_i32_0 = arith.constant 0 : i32
    %2 = arith.cmpi ne, %1, %c0_i32_0 : i32
    scf.if %2 {
      %cst_39 = arith.constant 0.000000e+00 : f32
      %74 = vector.broadcast %cst_39 : f32 to vector<1x1x128xf32>
      %c0_40 = arith.constant 0 : index
      %c0_41 = arith.constant 0 : index
      %c0_42 = arith.constant 0 : index
      %75 = vector.load %arg5[%c0_40, %c0_41, %c0_42] : memref<1x1x128xf32, #tpu.memory_space<vmem>>, vector<1x1x128xf32>
      tpu.vector_store %arg5[%c0_40, %c0_41, %c0_42], %74 {strides = array<i32>} : memref<1x1x128xf32, #tpu.memory_space<vmem>>, vector<1x1x128xf32>,
      %cst_43 = arith.constant 0.000000e+00 : f32
      %76 = vector.broadcast %cst_43 : f32 to vector<1x1x128xf32>
      %c0_44 = arith.constant 0 : index
      %c0_45 = arith.constant 0 : index
      %c0_46 = arith.constant 0 : index
      %77 = vector.load %arg6[%c0_44, %c0_45, %c0_46] : memref<1x1x128xf32, #tpu.memory_space<vmem>>, vector<1x1x128xf32>
      tpu.vector_store %arg6[%c0_44, %c0_45, %c0_46], %76 {strides = array<i32>} : memref<1x1x128xf32, #tpu.memory_space<vmem>>, vector<1x1x128xf32>,
      %cst_47 = arith.constant 0.000000e+00 : f32
      %78 = vector.broadcast %cst_47 : f32 to vector<1x1x128xf32>
      %c0_48 = arith.constant 0 : index
      %c0_49 = arith.constant 0 : index
      %c0_50 = arith.constant 0 : index
      %79 = vector.load %arg7[%c0_48, %c0_49, %c0_50] : memref<1x1x128xf32, #tpu.memory_space<vmem>>, vector<1x1x128xf32>
      tpu.vector_store %arg7[%c0_48, %c0_49, %c0_50], %78 {strides = array<i32>} : memref<1x1x128xf32, #tpu.memory_space<vmem>>, vector<1x1x128xf32>,
    } else {
    }
    %c0 = arith.constant 0 : index
    %c0_1 = arith.constant 0 : index
    %3 = vector.load %arg2[%c0, %c0_1] : memref<8x128xf32, #tpu.memory_space<vmem>>, vector<8x128xf32>
    %c0_2 = arith.constant 0 : index
    %c0_3 = arith.constant 0 : index
    %4 = vector.load %arg3[%c0_2, %c0_3] : memref<8x128xbf16, #tpu.memory_space<vmem>>, vector<8x128xbf16>
    %5 = arith.extf %4 : vector<8x128xbf16> to vector<8x128xf32>
    %c0_4 = arith.constant 0 : index
    %c0_5 = arith.constant 0 : index
    %6 = vector.load %arg4[%c0_4, %c0_5] : memref<1x128xf32, #tpu.memory_space<vmem>>, vector<1x128xf32>
    %7 = math.absf %3 : vector<8x128xf32>
    %cst = arith.constant 0.000000e+00 : f32
    %8 = vector.broadcast %cst : f32 to vector<8x128xf32>
    %9 = arith.subf %8, %7 : vector<8x128xf32>
    %10 = math.exp %9 : vector<8x128xf32>
    %11 = math.log1p %10 : vector<8x128xf32>
    %cst_6 = arith.constant 0.000000e+00 : f32
    %12 = vector.broadcast %cst_6 : f32 to vector<8x128xf32>
    %13 = arith.maximumf %3, %12 : vector<8x128xf32>
    %14 = arith.addf %11, %13 : vector<8x128xf32>
    %15 = arith.subf %14, %3 : vector<8x128xf32>
    %cst_7 = arith.constant 0.000000e+00 : f32
    %16 = vector.broadcast %cst_7 : f32 to vector<8x128xf32>
    %17 = arith.cmpf oge, %3, %16 : vector<8x128xf32>
    %cst_8 = arith.constant 1.000000e+00 : f32
    %18 = vector.broadcast %cst_8 : f32 to vector<8x128xf32>
    %19 = arith.select %17, %18, %10 : vector<8x128xi1>, vector<8x128xf32>
    %cst_9 = arith.constant 1.000000e+00 : f32
    %20 = vector.broadcast %cst_9 : f32 to vector<8x128xf32>
    %21 = arith.addf %20, %10 : vector<8x128xf32>
    %22 = arith.divf %19, %21 : vector<8x128xf32>
    %cst_10 = arith.constant 1.000000e+00 : f32
    %23 = vector.broadcast %cst_10 : f32 to vector<8x128xf32>
    %24 = arith.subf %23, %22 : vector<8x128xf32>
    %cst_11 = arith.constant 4.000000e-01 : f32
    %25 = vector.broadcast %cst_11 : f32 to vector<8x128xf32>
    %26 = arith.mulf %25, %14 : vector<8x128xf32>
    %27 = vector.broadcast %6 : vector<1x128xf32> to vector<8x128xf32>
    %28 = arith.mulf %27, %15 : vector<8x128xf32>
    %29 = arith.subf %28, %26 : vector<8x128xf32>
    %30 = arith.mulf %5, %29 : vector<8x128xf32>
    %31 = arith.addf %26, %30 : vector<8x128xf32>
    %cst_12 = arith.constant 9.99999993E-9 : f32
    %32 = vector.broadcast %cst_12 : f32 to vector<8x128xf32>
    %33 = arith.addf %22, %32 : vector<8x128xf32>
    %34 = math.log %33 : vector<8x128xf32>
    %cst_13 = arith.constant 9.99999993E-9 : f32
    %35 = vector.broadcast %cst_13 : f32 to vector<8x128xf32>
    %36 = arith.addf %24, %35 : vector<8x128xf32>
    %37 = math.log %36 : vector<8x128xf32>
    %38 = arith.mulf %24, %24 : vector<8x128xf32>
    %39 = arith.mulf %22, %22 : vector<8x128xf32>
    %cst_14 = arith.constant 2.970000e-01 : f32
    %40 = vector.broadcast %cst_14 : f32 to vector<8x128xf32>
    %41 = arith.mulf %40, %38 : vector<8x128xf32>
    %42 = arith.mulf %5, %41 : vector<8x128xf32>
    %43 = arith.mulf %42, %34 : vector<8x128xf32>
    %cst_15 = arith.constant 1.000000e+00 : f32
    %44 = vector.broadcast %cst_15 : f32 to vector<8x128xf32>
    %45 = arith.subf %44, %5 : vector<8x128xf32>
    %cst_16 = arith.constant 3.000000e-03 : f32
    %46 = vector.broadcast %cst_16 : f32 to vector<8x128xf32>
    %47 = arith.mulf %46, %39 : vector<8x128xf32>
    %48 = arith.mulf %45, %47 : vector<8x128xf32>
    %49 = arith.mulf %48, %37 : vector<8x128xf32>
    %50 = arith.addf %43, %49 : vector<8x128xf32>
    %cst_17 = arith.constant 0.000000e+00 : f32
    %51 = vector.broadcast %cst_17 : f32 to vector<8x128xf32>
    %52 = arith.subf %51, %50 : vector<8x128xf32>
    %53 = arith.addf %31, %52 : vector<8x128xf32>
    %c0_18 = arith.constant 0 : index
    %c0_19 = arith.constant 0 : index
    %c0_20 = arith.constant 0 : index
    %54 = vector.load %arg5[%c0_18, %c0_19, %c0_20] : memref<1x1x128xf32, #tpu.memory_space<vmem>>, vector<1x1x128xf32>
    %cst_21 = arith.constant dense<0.000000e+00> : vector<128xf32>
    %55 = vector.multi_reduction <add>, %53, %cst_21 [0] : vector<8x128xf32> to vector<128xf32>
    %56 = vector.shape_cast %55 : vector<128xf32> to vector<1x128xf32>
    %57 = vector.shape_cast %56 : vector<1x128xf32> to vector<1x1x128xf32>
    %58 = arith.addf %54, %57 : vector<1x1x128xf32>
    %c0_22 = arith.constant 0 : index
    %c0_23 = arith.constant 0 : index
    %c0_24 = arith.constant 0 : index
    %59 = vector.load %arg5[%c0_22, %c0_23, %c0_24] : memref<1x1x128xf32, #tpu.memory_space<vmem>>, vector<1x1x128xf32>
    tpu.vector_store %arg5[%c0_22, %c0_23, %c0_24], %58 {strides = array<i32>} : memref<1x1x128xf32, #tpu.memory_space<vmem>>, vector<1x1x128xf32>,
    %c0_25 = arith.constant 0 : index
    %c0_26 = arith.constant 0 : index
    %c0_27 = arith.constant 0 : index
    %60 = vector.load %arg6[%c0_25, %c0_26, %c0_27] : memref<1x1x128xf32, #tpu.memory_space<vmem>>, vector<1x1x128xf32>
    %61 = arith.mulf %22, %5 : vector<8x128xf32>
    %cst_28 = arith.constant dense<0.000000e+00> : vector<128xf32>
    %62 = vector.multi_reduction <add>, %61, %cst_28 [0] : vector<8x128xf32> to vector<128xf32>
    %63 = vector.shape_cast %62 : vector<128xf32> to vector<1x128xf32>
    %64 = vector.shape_cast %63 : vector<1x128xf32> to vector<1x1x128xf32>
    %65 = arith.addf %60, %64 : vector<1x1x128xf32>
    %c0_29 = arith.constant 0 : index
    %c0_30 = arith.constant 0 : index
    %c0_31 = arith.constant 0 : index
    %66 = vector.load %arg6[%c0_29, %c0_30, %c0_31] : memref<1x1x128xf32, #tpu.memory_space<vmem>>, vector<1x1x128xf32>
    tpu.vector_store %arg6[%c0_29, %c0_30, %c0_31], %65 {strides = array<i32>} : memref<1x1x128xf32, #tpu.memory_space<vmem>>, vector<1x1x128xf32>,
    %c0_32 = arith.constant 0 : index
    %c0_33 = arith.constant 0 : index
    %c0_34 = arith.constant 0 : index
    %67 = vector.load %arg7[%c0_32, %c0_33, %c0_34] : memref<1x1x128xf32, #tpu.memory_space<vmem>>, vector<1x1x128xf32>
    %68 = arith.addf %22, %5 : vector<8x128xf32>
    %cst_35 = arith.constant dense<0.000000e+00> : vector<128xf32>
    %69 = vector.multi_reduction <add>, %68, %cst_35 [0] : vector<8x128xf32> to vector<128xf32>
    %70 = vector.shape_cast %69 : vector<128xf32> to vector<1x128xf32>
    %71 = vector.shape_cast %70 : vector<1x128xf32> to vector<1x1x128xf32>
    %72 = arith.addf %67, %71 : vector<1x1x128xf32>
    %c0_36 = arith.constant 0 : index
    %c0_37 = arith.constant 0 : index
    %c0_38 = arith.constant 0 : index
    %73 = vector.load %arg7[%c0_36, %c0_37, %c0_38] : memref<1x1x128xf32, #tpu.memory_space<vmem>>, vector<1x1x128xf32>
    tpu.vector_store %arg7[%c0_36, %c0_37, %c0_38], %72 {strides = array<i32>} : memref<1x1x128xf32, #tpu.memory_space<vmem>>, vector<1x1x128xf32>,
    return
  }
  func.func @transform_0(%arg0: i32, %arg1: i32) -> (i32, i32) {
    %c1_i32 = arith.constant 1 : i32
    %0 = arith.muli %arg0, %c1_i32 : i32
    %1 = arith.addi %0, %arg1 : i32
    %c0_i32 = arith.constant 0 : i32
    %c0_i32_0 = arith.constant 0 : i32
    return %1, %c0_i32 : i32, i32
  }
  func.func @transform_1(%arg0: i32, %arg1: i32) -> (i32, i32) {
    %c1_i32 = arith.constant 1 : i32
    %0 = arith.muli %arg0, %c1_i32 : i32
    %1 = arith.addi %0, %arg1 : i32
    %c0_i32 = arith.constant 0 : i32
    %c0_i32_0 = arith.constant 0 : i32
    return %1, %c0_i32 : i32, i32
  }
  func.func @transform_2(%arg0: i32, %arg1: i32) -> (i32, i32) {
    %c0_i32 = arith.constant 0 : i32
    %c0_i32_0 = arith.constant 0 : i32
    %c0_i32_1 = arith.constant 0 : i32
    return %c0_i32, %c0_i32_0 : i32, i32
  }
  func.func @transform_3(%arg0: i32, %arg1: i32) -> (i32, i32, i32) {
    %c0_i32 = arith.constant 0 : i32
    %c0_i32_0 = arith.constant 0 : i32
    %c0_i32_1 = arith.constant 0 : i32
    return %arg0, %c0_i32, %c0_i32_0 : i32, i32, i32
  }
  func.func @transform_4(%arg0: i32, %arg1: i32) -> (i32, i32, i32) {
    %c0_i32 = arith.constant 0 : i32
    %c0_i32_0 = arith.constant 0 : i32
    %c0_i32_1 = arith.constant 0 : i32
    return %arg0, %c0_i32, %c0_i32_0 : i32, i32, i32
  }
  func.func @transform_5(%arg0: i32, %arg1: i32) -> (i32, i32, i32) {
    %c0_i32 = arith.constant 0 : i32
    %c0_i32_0 = arith.constant 0 : i32
    %c0_i32_1 = arith.constant 0 : i32
    return %arg0, %c0_i32, %c0_i32_0 : i32, i32, i32
  }
}

</mosaic_0001>

<bundles_post_ra>
// kernel: tpu_custom_call.1
= control target key start
LH: loop header
LB: loop body
LE: loop exit
PB: predicated region body
PF: predicated region fallthrough
CT: control target
= control target key end

     0   :  { %11 = vsyncpa [#allocation3], 0  ;;  %s404_s0 = inlined_call_operand.hbm [shape: f32[8,128], index: 0, kind: input, shape index: {}]   ;;  %s405_s1 = inlined_call_operand.hbm [shape: bf16[8,128], index: 1, kind: input, shape index: {}]   ;;  %s406_s2 = inlined_call_operand.vmem [shape: f32[1,128], index: 2, kind: input, shape index: {}]   ;;  %s407_s3 = inlined_call_operand.hbm [shape: f32[1,1,128], index: 3, kind: output, shape index: {0}]   ;;  %s408_s4 = inlined_call_operand.hbm [shape: f32[1,1,128], index: 4, kind: output, shape index: {1}]   ;;  %s409_s5 = inlined_call_operand.hbm [shape: f32[1,1,128], index: 5, kind: output, shape index: {2}]  }
   0x1   :  { %12 = vsyncpa [#allocation6], 0 }
   0x2   :  { %13 = vsyncpa [#allocation4], 0 }
   0x3   :  { %14 = vsyncpa [#allocation9], 0  ;;  %s23_s20 = sshll.u32 %s404_s0, 4  ;;  %s350_s21 = smov [#allocation2]   ;;  %s24_s20 = int_to_ptr.hbm [resolvable:$true] %s23_s20 }
   0x4   :  { %s25_s22 = sshll.u32 %s350_s21, 4  ;;  %s37_s25 = sshll.u32 %s405_s1, 4  ;;  %s26_s22 = int_to_ptr.vmem [resolvable:$true] %s25_s22  ;;  %s38_s25 = int_to_ptr.hbm [resolvable:$true] %s37_s25 }
   0x5   :  { %28 = dma.hbm_to_vmem [thread:$0]  %s24_s20, 128, %s26_s22, [#allocation3]  }
   0x6   :  { %s351_s26 = smov [#allocation5]  }
   0x7   :  { %s39_s27 = sshll.u32 %s351_s26, 4  ;;  %s40_s27 = int_to_ptr.vmem [resolvable:$true] %s39_s27 }
   0x8   :  { %42 = dma.hbm_to_vmem [thread:$0]  %s38_s25, 64, %s40_s27, [#allocation6]  }
   0x9   :  { %342 = dma.done.wait [#allocation3], 128  }
   0xa   :  { %343 = vsyncadd [#allocation3], 4294967168 }
   0xb   :  { %344 = dma.done.wait [#allocation6], 64  }
   0xc   :  { %345 = vsyncadd [#allocation6], 4294967232  ;;  %v352_v0 = vmov 0.0   ;;  %v62_v1 = vld [vmem:[#allocation2] sm:$0xff]  ;;  %v63_v23 = vld [vmem:[#allocation5] sm:$0xf] }
   0xd   :  { %60 = vst [vmem:[#allocation8] sm:$0x1] %v352_v0  ;;  %v66_v2 = vand.u32 2147483647, %v62_v1  ;;  %v79_v18 = vmax.f32 %v62_v1, 0.0  ;;  %vm82_vm3 = vcmp.ge.f32.partialorder %v62_v1, 0.0  ;;  %v64_v28 = vunpack.c.l.bf16 %v63_v23 }
   0xe   :  { %59 = vst [vmem:[#allocation7] sm:$0x1] %v352_v0  ;;  %v211_v31 = vld [vmem:[%s406_s2] ss:$0 sm:$0xff]  ;;  %s174_s29 = sshll.u32 %s408_s4, 4  ;;  %s353_s30 = smov [#allocation8]   ;;  %s175_s29 = int_to_ptr.hbm [resolvable:$true] %s174_s29 }
   0xf   :  { %61 = vst [vmem:[#allocation10] sm:$0x1] %v352_v0  ;;  %v67_v3 = vsub.f32 0.0, %v66_v2  ;;  %v120_v45 = vsub.f32 1.0, %v64_v28  ;;  %s172_s6 = sshll.u32 %s353_s30, 4  ;;  %s354_s7 = smov [#allocation10]   ;;  %s173_s6 = int_to_ptr.vmem [resolvable:$true] %s172_s6 }
  0x10   :  { %s183_s8 = sshll.u32 %s354_s7, 4  ;;  %s185_s11 = sshll.u32 %s409_s5, 4  ;;  %s184_s8 = int_to_ptr.vmem [resolvable:$true] %s183_s8  ;;  %s186_s11 = int_to_ptr.hbm [resolvable:$true] %s185_s11 }
  0x11   :  { %v68_v4 = vmul.f32 1.442695, %v67_v3  ;;  %s355_s4 = smov [#allocation7]   ;;  %s163_s14 = sshll.u32 %s407_s3, 4  ;;  %s164_s14 = int_to_ptr.hbm [resolvable:$true] %s163_s14 }
  0x12   :  { %s161_s5 = sshll.u32 %s355_s4, 4  ;;  %s162_s5 = int_to_ptr.vmem [resolvable:$true] %s161_s5 }
  0x13   :  { %212 = vpow2.f32 %v68_v4 }
  0x14   :  { %v136_v59 = vld [vmem:[#allocation8] sm:$0x1] }
  0x19   :  { %v213_v5 = vpop.eup %212 }
  0x1a   :  { %v70_v6 = vadd.f32 1.0, %v213_v5  ;;  %v73_v7 = vmul.f32 -0.5, %v213_v5  ;;  %v76_v9 = vand.u32 2147483647, %v213_v5  ;;  %v83_v24 = vsel %vm82_vm3, 1.0, %v213_v5 }
  0x1c   :  { %214 = vrcp.f32 %v70_v6  ;;  %v74_v8 = vadd.f32 1.0, %v73_v7  ;;  %v96_v14 = vand.u32 2147483648, %v70_v6  ;;  %vm77_vm0 = vcmp.lt.f32.partialorder %v76_v9, 0.0004427343 }
  0x1d   :  { %216 = vlog2.f32 %v70_v6  ;;  %vm90_vm1 = vweird.f32 %v70_v6  ;;  %v94_v17 = vand.u32 2147483647, %v70_v6 }
  0x1e   :  { %v75_v13 = vmul.f32 %v213_v5, %v74_v8  ;;  %v97_v21 = vor.u32 1.1754944e-38, %v96_v14 }
  0x1f   :  { %vm95_vm5 = vcmp.eq.f32.partialorder %v94_v17, 8.507059e+37 }
  0x22   :  { %v215_v10 = vpop.eup %214 }
  0x23   :  { %v217_v11 = vpop.eup %216  ;;  %v86_v12 = vmul.f32 %v215_v10, %v70_v6  ;;  %vm91_vm2 = vweird.f32 %v215_v10 }
  0x24   :  { %v72_v15 = vmul.f32 0.6931472, %v217_v11  ;;  %vm92_vm4 = vmor %vm90_vm1, %vm91_vm2 }
  0x25   :  { %v87_v16 = vsub.f32 1.0, %v86_v12 }
  0x26   :  { %v78_v20 = vsel %vm77_vm0, %v75_v13, %v72_v15  ;;  %v127_v15 = vld [vmem:[#allocation7] sm:$0x1] }
  0x27   :  { %v88_v19 = vmul.f32 %v215_v10, %v87_v16  ;;  %v80_v25 = vadd.f32 %v79_v18, %v78_v20 }
  0x29   :  { %v89_v22 = vadd.f32 %v215_v10, %v88_v19  ;;  %v81_v30 = vsub.f32 %v80_v25, %v62_v1  ;;  %v101_v39 = vmul.f32 0.4, %v80_v25  ;;  %v146_v1 = vld [vmem:[#allocation10] sm:$0x1] }
  0x2b   :  { %v93_v26 = vsel %vm92_vm4, %v215_v10, %v89_v22  ;;  %v105_v40 = vmul.f32 %v211_v31, %v81_v30 }
  0x2c   :  { %v98_v27 = vsel %vm95_vm5, %v97_v21, %v93_v26 }
  0x2d   :  { %v99_v29 = vmul.f32 %v98_v27, %v83_v24  ;;  %v106_v49 = vsub.f32 %v105_v40, %v101_v39 }
  0x2f   :  { %v137_v32 = vmul.f32 %v99_v29, %v64_v28  ;;  %v100_v33 = vsub.f32 1.0, %v99_v29  ;;  %v109_v34 = vadd.f32 1e-08, %v99_v29  ;;  %v116_v35 = vmul.f32 %v99_v29, %v99_v29 }
  0x30   :  { %v147_v36 = vadd.f32 %v99_v29, %v64_v28  ;;  %v107_v60 = vmul.f32 %v106_v49, %v64_v28 }
  0x31   :  { %v138_v37 = vrot.slane %v137_v32, 4  ;;  %218 = vlog2.f32 %v109_v34  ;;  %v112_v38 = vadd.f32 1e-08, %v100_v33  ;;  %v115_v41 = vmul.f32 %v100_v33, %v100_v33 }
  0x32   :  { %v148_v42 = vrot.slane %v147_v36, 4  ;;  %v121_v46 = vmul.f32 0.003, %v116_v35  ;;  %v108_v5 = vadd.f32 %v107_v60, %v101_v39 }
  0x33   :  { %v139_v43 = vadd.f32 %v138_v37, %v137_v32  ;;  %220 = vlog2.f32 %v112_v38  ;;  %v117_v44 = vmul.f32 0.297, %v115_v41 }
  0x34   :  { %v149_v47 = vadd.f32 %v148_v42, %v147_v36  ;;  %v122_v55 = vmul.f32 %v121_v46, %v120_v45 }
  0x35   :  { %v140_v48 = vrot.slane %v139_v43, 2  ;;  %v118_v50 = vmul.f32 %v117_v44, %v64_v28 }
  0x36   :  { %v150_v51 = vrot.slane %v149_v47, 2 }
  0x37   :  { %v219_v52 = vpop.eup %218  ;;  %v141_v53 = vadd.f32 %v140_v48, %v139_v43 }
  0x38   :  { %v111_v54 = vmul.f32 0.6931472, %v219_v52  ;;  %v151_v56 = vadd.f32 %v150_v51, %v149_v47 }
  0x39   :  { %v221_v57 = vpop.eup %220  ;;  %v142_v58 = vrot.slane %v141_v53, 1 }
  0x3a   :  { %v114_v61 = vmul.f32 0.6931472, %v221_v57  ;;  %v119_v62 = vmul.f32 %v118_v50, %v111_v54  ;;  %v152_v63 = vrot.slane %v151_v56, 1 }
  0x3b   :  { %v143_v0 = vadd.f32 %v142_v58, %v141_v53 }
  0x3c   :  { %v123_v2 = vmul.f32 %v122_v55, %v114_v61  ;;  %v153_v3 = vadd.f32 %v152_v63, %v151_v56 }
  0x3d   :  { %v144_v4 = vadd.f32 %v143_v0, %v136_v59 }
  0x3e   :  { %v124_v6 = vadd.f32 %v123_v2, %v119_v62  ;;  %v154_v7 = vadd.f32 %v153_v3, %v146_v1 }
  0x3f   :  { %145 = vst [vmem:[#allocation8] sm:$0x1] %v144_v4 }
  0x40   :  { %v125_v8 = vsub.f32 0.0, %v124_v6  ;;  %155 = vst [vmem:[#allocation10] sm:$0x1] %v154_v7  ;;  %177 = dma.vmem_to_hbm [thread:$0]  %s173_s6, 16, %s175_s29, [#allocation9]  }
  0x41   :  { %188 = dma.vmem_to_hbm [thread:$0]  %s184_s8, 16, %s186_s11, [#allocation9]  }
  0x42   :  { %v126_v9 = vadd.f32 %v125_v8, %v108_v5 }
  0x44   :  { %v128_v10 = vrot.slane %v126_v9, 4 }
  0x46   :  { %v129_v11 = vadd.f32 %v128_v10, %v126_v9 }
  0x48   :  { %v130_v12 = vrot.slane %v129_v11, 2 }
  0x4a   :  { %v131_v13 = vadd.f32 %v130_v12, %v129_v11 }
  0x4c   :  { %v132_v14 = vrot.slane %v131_v13, 1 }
  0x4e   :  { %v133_v16 = vadd.f32 %v132_v14, %v131_v13 }
  0x50   :  { %v134_v17 = vadd.f32 %v133_v16, %v127_v15 }
  0x52   :  { %135 = vst [vmem:[#allocation7] sm:$0x1] %v134_v17 }
  0x53   :  { %166 = dma.vmem_to_hbm [thread:$0]  %s162_s5, 16, %s164_s14, [#allocation4]  }
  0x54   :  { %346 = dma.done.wait [#allocation4], 16  }
  0x55   :  { %347 = vsyncadd [#allocation4], 4294967280 }
  0x56   :  { %348 = dma.done.wait [#allocation9], 32  }
  0x57   :  { %349 = vsyncadd [#allocation9], 4294967264 }
  0x58   :  { %201 = vsyncpa [#allocation3], 1 }
  0x59   :  { %202 = vsyncpa [#allocation6], 1 }
  0x5a   :  { %203 = vsyncpa [#allocation4], 1 }
  0x5b   :  { %204 = vsyncpa [#allocation9], 1 }

</bundles_post_ra>
